<compile_context>
chip_gen: v7x
topology: tpu7x:2x2x1
jax: 0.10.0
libtpu: 0.0.40
codegen_flags: <defaults>
</compile_context>

<pallas_src>
import jax
import jax.numpy as jnp
from jax.experimental import pallas as pl
from jax.experimental.pallas import tpu as pltpu

# ---------------- Config (mirrors `cfg` used by the PyTorch MLP) -------------
IN_DIM = 64            # img (B, 1, 8, 8) -> flatten -> (B, 64)
HIDDEN_DIM = 32
BLOCKS = 4
LAYERS = 3             # Linear(in,hid)+ReLU, Linear(hid,hid)+ReLU, Linear(hid,out)
BLOCK_OUT_DIM = 16     # cfg.block_output_dim
MERGE_DIM = 4          # cfg.merge_dim
ACTIVATION = 1         # 1 -> SmoothStep applied to every MLP block output
KERNEL_SIZE = 3        # cparams has kernel_size**2 = 9 entries
SS_GAMMA = 1.0

FUSED_HID = BLOCKS * HIDDEN_DIM        # 128 (lane-dense)
FUSED_OUT = BLOCKS * BLOCK_OUT_DIM     # 64
KS2 = KERNEL_SIZE ** 2                 # 9


def _smooth_step(x):
    lo = -SS_GAMMA / 2.0
    hi = SS_GAMMA / 2.0
    a3 = -2.0 / SS_GAMMA ** 3
    a1 = 3.0 / (2.0 * SS_GAMMA)
    poly = a3 * x * x * x + a1 * x + 0.5
    return jnp.where(x <= lo, jnp.zeros_like(x),
                     jnp.where(x >= hi, jnp.ones_like(x), poly))


# ------------------------------ Pallas kernel --------------------------------
def mlp_fused_kernel(cp_ref, m_ref, x_ref, w1_ref, w2_ref, w3_ref, o_ref):
    """Single invocation: all 4 MLP blocks fused into 3 lane-dense matmuls.

    cp_ref : SMEM (ks^2,)            flattened cparams
    m_ref  : SMEM (ks^2*blocks,)     folded merge matrix, layout [j*BLOCKS + i]
    x_ref  : VMEM (B, 64)            flattened image
    w1_ref : VMEM (64, 128)          per-block W1 concatenated along fan_out
    w2_ref : VMEM (128, 128)         block-diagonal stack of per-block W2
    w3_ref : VMEM (128, 64)          block-diagonal stack of per-block W3
    o_ref  : VMEM (B, 16)            weighted sum over blocks
    """
    # ---- merge path on the scalar (SMEM) path: h[i] = sum_j cp[j] * M[j, i]
    h = []
    for i in range(BLOCKS):
        acc = cp_ref[0] * m_ref[i]
        for j in range(1, KS2):
            acc = acc + cp_ref[j] * m_ref[j * BLOCKS + i]
        h.append(acc)

    # ---- three 128-wide matmuls cover all 4 blocks at once
    x = x_ref[...]                                                     # (B, 64)
    a1 = jnp.maximum(
        jnp.dot(x, w1_ref[...], preferred_element_type=jnp.float32), 0.0)   # (B, 128)
    a2 = jnp.maximum(
        jnp.dot(a1, w2_ref[...], preferred_element_type=jnp.float32), 0.0)  # (B, 128)
    y = jnp.dot(a2, w3_ref[...], preferred_element_type=jnp.float32)        # (B, 64)
    if ACTIVATION != 0:
        y = _smooth_step(y)

    # ---- weighted sum over blocks via static lane slices (no accumulator ref)
    out = h[0] * y[:, :BLOCK_OUT_DIM]
    for i in range(1, BLOCKS):
        out = out + h[i] * y[:, i * BLOCK_OUT_DIM:(i + 1) * BLOCK_OUT_DIM]
    o_ref[...] = out


# ------------------------------ Param packing ---------------------------------
def _block_diag(blocks_arr):
    """(nb, r, c) -> (nb*r, nb*c) block-diagonal."""
    nb, r, c = blocks_arr.shape
    out = jnp.zeros((nb * r, nb * c), blocks_arr.dtype)
    for i in range(nb):
        out = out.at[i * r:(i + 1) * r, i * c:(i + 1) * c].set(blocks_arr[i])
    return out


def pack_params(params):
    """One-time host-side repack into lane-dense fused operands."""
    w1, w2, w3, mtx1, mtx2 = params
    # W1 fused along fan_out: columns [i*H:(i+1)*H] == W1[i]
    w1f = jnp.transpose(w1, (1, 0, 2)).reshape(IN_DIM, FUSED_HID)
    w2bd = _block_diag(w2)                       # (128, 128)
    w3bd = _block_diag(w3)                       # (128, 64)
    # Fold the merge path:  h = flatten(cp[:,None]*mtx1) @ mtx2  ==  cp @ M
    # with M[j, i] = sum_m mtx1[j, m] * mtx2[j*MERGE_DIM + m, i]
    m = jnp.einsum('jm,jmi->ji', mtx1, mtx2.reshape(KS2, MERGE_DIM, BLOCKS))
    m_flat = m.reshape(-1)                       # layout [j*BLOCKS + i]
    return (w1f.astype(jnp.float32), w2bd.astype(jnp.float32),
            w3bd.astype(jnp.float32), m_flat.astype(jnp.float32))


# ------------------------------ Wrapper ---------------------------------------
def _mlp_forward(img, cparams, packed):
    w1f, w2bd, w3bd, m_flat = packed
    B = img.shape[0]
    x = img.reshape(B, -1).astype(jnp.float32)                        # (B, in_dim)
    cp = cparams.reshape(-1).astype(jnp.float32)                      # (ks^2,)

    out = pl.pallas_call(
        mlp_fused_kernel,
        out_shape=jax.ShapeDtypeStruct((B, BLOCK_OUT_DIM), jnp.float32),
        grid=(1,),
        in_specs=[
            pl.BlockSpec(memory_space=pltpu.MemorySpace.SMEM),              # cp
            pl.BlockSpec(memory_space=pltpu.MemorySpace.SMEM),              # folded merge mtx
            pl.BlockSpec((B, IN_DIM), lambda i: (0, 0)),                    # x
            pl.BlockSpec((IN_DIM, FUSED_HID), lambda i: (0, 0)),            # W1 fused
            pl.BlockSpec((FUSED_HID, FUSED_HID), lambda i: (0, 0)),         # W2 block-diag
            pl.BlockSpec((FUSED_HID, FUSED_OUT), lambda i: (0, 0)),         # W3 block-diag
        ],
        out_specs=pl.BlockSpec((B, BLOCK_OUT_DIM), lambda i: (0, 0)),
        compiler_params=pltpu.CompilerParams(
            dimension_semantics=("arbitrary",)),
    )(cp, m_flat, x, w1f, w2bd, w3bd)
    return out


mlp_forward = jax.jit(_mlp_forward)


# ------------------------------ Params / reference ---------------------------
def init_params(key):
    k1, k2, k3, k4, k5 = jax.random.split(key, 5)
    lim1 = 1.0 / (IN_DIM ** 0.5)
    lim2 = 1.0 / (HIDDEN_DIM ** 0.5)
    # stacked per-block weights, stored as (fan_in, fan_out) so x @ W works
    w1 = jax.random.uniform(k1, (BLOCKS, IN_DIM, HIDDEN_DIM),
                            jnp.float32, -lim1, lim1)
    w2 = jax.random.uniform(k2, (BLOCKS, HIDDEN_DIM, HIDDEN_DIM),
                            jnp.float32, -lim2, lim2)
    w3 = jax.random.uniform(k3, (BLOCKS, HIDDEN_DIM, BLOCK_OUT_DIM),
                            jnp.float32, -lim2, lim2)
    # torch.rand -> uniform [0, 1)
    mtx1 = jax.random.uniform(k4, (KS2, MERGE_DIM), jnp.float32)
    mtx2 = jax.random.uniform(k5, (KS2 * MERGE_DIM, BLOCKS), jnp.float32)
    return (w1, w2, w3, mtx1, mtx2)


def reference(img, cparams, params):
    w1, w2, w3, mtx1, mtx2 = params
    x = img.reshape(img.shape[0], -1).astype(jnp.float32)
    cp = cparams.reshape(-1).astype(jnp.float32)
    h = (cp[:, None] * mtx1).reshape(-1) @ mtx2
    out = jnp.zeros((x.shape[0], BLOCK_OUT_DIM), jnp.float32)
    for i in range(BLOCKS):
        a1 = jnp.maximum(x @ w1[i], 0.0)
        a2 = jnp.maximum(a1 @ w2[i], 0.0)
        y = a2 @ w3[i]
        if ACTIVATION != 0:
            y = _smooth_step(y)
        out = out + h[i] * y
    return out


if __name__ == "__main__":
    key = jax.random.PRNGKey(0)
    kp, ki, kc = jax.random.split(key, 3)
    params = init_params(kp)
    packed = pack_params(params)                                       # one-time repack
    img = jax.random.normal(ki, (2, 1, 8, 8), jnp.float32)             # NCHW
    cparams = jax.random.uniform(kc, (KERNEL_SIZE, KERNEL_SIZE), jnp.float32)

    out = mlp_forward(img, cparams, packed)
    out = jax.block_until_ready(out)

    ref = reference(img, cparams, params)
    assert out.shape == (2, BLOCK_OUT_DIM)
    assert jnp.allclose(out, ref, atol=1e-5, rtol=1e-5), "mismatch vs reference"
    print("KERNEL_OK")
</pallas_src>

<mosaic_0001>
module attributes {stable_mosaic.version = 11 : i64} {
  func.func @mlp_fused_kernel(%arg0: i32, %arg1: memref<9xf32, #tpu.memory_space<smem>>, %arg2: memref<36xf32, #tpu.memory_space<smem>>, %arg3: memref<2x64xf32, #tpu.memory_space<vmem>>, %arg4: memref<64x128xf32, #tpu.memory_space<vmem>>, %arg5: memref<128x128xf32, #tpu.memory_space<vmem>>, %arg6: memref<128x64xf32, #tpu.memory_space<vmem>>, %arg7: memref<2x16xf32, #tpu.memory_space<vmem>>) attributes {dimension_semantics = [#tpu.dimension_semantics<arbitrary>], iteration_bounds = array<i64: 1>, scalar_prefetch = 0 : i64, scratch_operands = 0 : i64, tpu.core_type = #tpu.core_type<tc>, window_params = [{transform_indices = @transform_0, window_bounds = array<i64: 9>}, {transform_indices = @transform_1, window_bounds = array<i64: 36>}, {pipeline_mode = #tpu.pipeline_mode<synchronous>, transform_indices = @transform_2, window_bounds = array<i64: 2, 64>}, {pipeline_mode = #tpu.pipeline_mode<synchronous>, transform_indices = @transform_3, window_bounds = array<i64: 64, 128>}, {pipeline_mode = #tpu.pipeline_mode<synchronous>, transform_indices = @transform_4, window_bounds = array<i64: 128, 128>}, {pipeline_mode = #tpu.pipeline_mode<synchronous>, transform_indices = @transform_5, window_bounds = array<i64: 128, 64>}, {pipeline_mode = #tpu.pipeline_mode<synchronous>, transform_indices = @transform_6, window_bounds = array<i64: 2, 16>}]} {
    %c0 = arith.constant 0 : index
    %0 = memref.load %arg1[%c0] : memref<9xf32, #tpu.memory_space<smem>>
    %c0_0 = arith.constant 0 : index
    %1 = memref.load %arg2[%c0_0] : memref<36xf32, #tpu.memory_space<smem>>
    %2 = arith.mulf %0, %1 : f32
    %c1 = arith.constant 1 : index
    %3 = memref.load %arg1[%c1] : memref<9xf32, #tpu.memory_space<smem>>
    %c4 = arith.constant 4 : index
    %4 = memref.load %arg2[%c4] : memref<36xf32, #tpu.memory_space<smem>>
    %5 = arith.mulf %3, %4 : f32
    %6 = arith.addf %2, %5 : f32
    %c2 = arith.constant 2 : index
    %7 = memref.load %arg1[%c2] : memref<9xf32, #tpu.memory_space<smem>>
    %c8 = arith.constant 8 : index
    %8 = memref.load %arg2[%c8] : memref<36xf32, #tpu.memory_space<smem>>
    %9 = arith.mulf %7, %8 : f32
    %10 = arith.addf %6, %9 : f32
    %c3 = arith.constant 3 : index
    %11 = memref.load %arg1[%c3] : memref<9xf32, #tpu.memory_space<smem>>
    %c12 = arith.constant 12 : index
    %12 = memref.load %arg2[%c12] : memref<36xf32, #tpu.memory_space<smem>>
    %13 = arith.mulf %11, %12 : f32
    %14 = arith.addf %10, %13 : f32
    %c4_1 = arith.constant 4 : index
    %15 = memref.load %arg1[%c4_1] : memref<9xf32, #tpu.memory_space<smem>>
    %c16 = arith.constant 16 : index
    %16 = memref.load %arg2[%c16] : memref<36xf32, #tpu.memory_space<smem>>
    %17 = arith.mulf %15, %16 : f32
    %18 = arith.addf %14, %17 : f32
    %c5 = arith.constant 5 : index
    %19 = memref.load %arg1[%c5] : memref<9xf32, #tpu.memory_space<smem>>
    %c20 = arith.constant 20 : index
    %20 = memref.load %arg2[%c20] : memref<36xf32, #tpu.memory_space<smem>>
    %21 = arith.mulf %19, %20 : f32
    %22 = arith.addf %18, %21 : f32
    %c6 = arith.constant 6 : index
    %23 = memref.load %arg1[%c6] : memref<9xf32, #tpu.memory_space<smem>>
    %c24 = arith.constant 24 : index
    %24 = memref.load %arg2[%c24] : memref<36xf32, #tpu.memory_space<smem>>
    %25 = arith.mulf %23, %24 : f32
    %26 = arith.addf %22, %25 : f32
    %c7 = arith.constant 7 : index
    %27 = memref.load %arg1[%c7] : memref<9xf32, #tpu.memory_space<smem>>
    %c28 = arith.constant 28 : index
    %28 = memref.load %arg2[%c28] : memref<36xf32, #tpu.memory_space<smem>>
    %29 = arith.mulf %27, %28 : f32
    %30 = arith.addf %26, %29 : f32
    %c8_2 = arith.constant 8 : index
    %31 = memref.load %arg1[%c8_2] : memref<9xf32, #tpu.memory_space<smem>>
    %c32 = arith.constant 32 : index
    %32 = memref.load %arg2[%c32] : memref<36xf32, #tpu.memory_space<smem>>
    %33 = arith.mulf %31, %32 : f32
    %34 = arith.addf %30, %33 : f32
    %c0_3 = arith.constant 0 : index
    %35 = memref.load %arg1[%c0_3] : memref<9xf32, #tpu.memory_space<smem>>
    %c1_4 = arith.constant 1 : index
    %36 = memref.load %arg2[%c1_4] : memref<36xf32, #tpu.memory_space<smem>>
    %37 = arith.mulf %35, %36 : f32
    %c1_5 = arith.constant 1 : index
    %38 = memref.load %arg1[%c1_5] : memref<9xf32, #tpu.memory_space<smem>>
    %c5_6 = arith.constant 5 : index
    %39 = memref.load %arg2[%c5_6] : memref<36xf32, #tpu.memory_space<smem>>
    %40 = arith.mulf %38, %39 : f32
    %41 = arith.addf %37, %40 : f32
    %c2_7 = arith.constant 2 : index
    %42 = memref.load %arg1[%c2_7] : memref<9xf32, #tpu.memory_space<smem>>
    %c9 = arith.constant 9 : index
    %43 = memref.load %arg2[%c9] : memref<36xf32, #tpu.memory_space<smem>>
    %44 = arith.mulf %42, %43 : f32
    %45 = arith.addf %41, %44 : f32
    %c3_8 = arith.constant 3 : index
    %46 = memref.load %arg1[%c3_8] : memref<9xf32, #tpu.memory_space<smem>>
    %c13 = arith.constant 13 : index
    %47 = memref.load %arg2[%c13] : memref<36xf32, #tpu.memory_space<smem>>
    %48 = arith.mulf %46, %47 : f32
    %49 = arith.addf %45, %48 : f32
    %c4_9 = arith.constant 4 : index
    %50 = memref.load %arg1[%c4_9] : memref<9xf32, #tpu.memory_space<smem>>
    %c17 = arith.constant 17 : index
    %51 = memref.load %arg2[%c17] : memref<36xf32, #tpu.memory_space<smem>>
    %52 = arith.mulf %50, %51 : f32
    %53 = arith.addf %49, %52 : f32
    %c5_10 = arith.constant 5 : index
    %54 = memref.load %arg1[%c5_10] : memref<9xf32, #tpu.memory_space<smem>>
    %c21 = arith.constant 21 : index
    %55 = memref.load %arg2[%c21] : memref<36xf32, #tpu.memory_space<smem>>
    %56 = arith.mulf %54, %55 : f32
    %57 = arith.addf %53, %56 : f32
    %c6_11 = arith.constant 6 : index
    %58 = memref.load %arg1[%c6_11] : memref<9xf32, #tpu.memory_space<smem>>
    %c25 = arith.constant 25 : index
    %59 = memref.load %arg2[%c25] : memref<36xf32, #tpu.memory_space<smem>>
    %60 = arith.mulf %58, %59 : f32
    %61 = arith.addf %57, %60 : f32
    %c7_12 = arith.constant 7 : index
    %62 = memref.load %arg1[%c7_12] : memref<9xf32, #tpu.memory_space<smem>>
    %c29 = arith.constant 29 : index
    %63 = memref.load %arg2[%c29] : memref<36xf32, #tpu.memory_space<smem>>
    %64 = arith.mulf %62, %63 : f32
    %65 = arith.addf %61, %64 : f32
    %c8_13 = arith.constant 8 : index
    %66 = memref.load %arg1[%c8_13] : memref<9xf32, #tpu.memory_space<smem>>
    %c33 = arith.constant 33 : index
    %67 = memref.load %arg2[%c33] : memref<36xf32, #tpu.memory_space<smem>>
    %68 = arith.mulf %66, %67 : f32
    %69 = arith.addf %65, %68 : f32
    %c0_14 = arith.constant 0 : index
    %70 = memref.load %arg1[%c0_14] : memref<9xf32, #tpu.memory_space<smem>>
    %c2_15 = arith.constant 2 : index
    %71 = memref.load %arg2[%c2_15] : memref<36xf32, #tpu.memory_space<smem>>
    %72 = arith.mulf %70, %71 : f32
    %c1_16 = arith.constant 1 : index
    %73 = memref.load %arg1[%c1_16] : memref<9xf32, #tpu.memory_space<smem>>
    %c6_17 = arith.constant 6 : index
    %74 = memref.load %arg2[%c6_17] : memref<36xf32, #tpu.memory_space<smem>>
    %75 = arith.mulf %73, %74 : f32
    %76 = arith.addf %72, %75 : f32
    %c2_18 = arith.constant 2 : index
    %77 = memref.load %arg1[%c2_18] : memref<9xf32, #tpu.memory_space<smem>>
    %c10 = arith.constant 10 : index
    %78 = memref.load %arg2[%c10] : memref<36xf32, #tpu.memory_space<smem>>
    %79 = arith.mulf %77, %78 : f32
    %80 = arith.addf %76, %79 : f32
    %c3_19 = arith.constant 3 : index
    %81 = memref.load %arg1[%c3_19] : memref<9xf32, #tpu.memory_space<smem>>
    %c14 = arith.constant 14 : index
    %82 = memref.load %arg2[%c14] : memref<36xf32, #tpu.memory_space<smem>>
    %83 = arith.mulf %81, %82 : f32
    %84 = arith.addf %80, %83 : f32
    %c4_20 = arith.constant 4 : index
    %85 = memref.load %arg1[%c4_20] : memref<9xf32, #tpu.memory_space<smem>>
    %c18 = arith.constant 18 : index
    %86 = memref.load %arg2[%c18] : memref<36xf32, #tpu.memory_space<smem>>
    %87 = arith.mulf %85, %86 : f32
    %88 = arith.addf %84, %87 : f32
    %c5_21 = arith.constant 5 : index
    %89 = memref.load %arg1[%c5_21] : memref<9xf32, #tpu.memory_space<smem>>
    %c22 = arith.constant 22 : index
    %90 = memref.load %arg2[%c22] : memref<36xf32, #tpu.memory_space<smem>>
    %91 = arith.mulf %89, %90 : f32
    %92 = arith.addf %88, %91 : f32
    %c6_22 = arith.constant 6 : index
    %93 = memref.load %arg1[%c6_22] : memref<9xf32, #tpu.memory_space<smem>>
    %c26 = arith.constant 26 : index
    %94 = memref.load %arg2[%c26] : memref<36xf32, #tpu.memory_space<smem>>
    %95 = arith.mulf %93, %94 : f32
    %96 = arith.addf %92, %95 : f32
    %c7_23 = arith.constant 7 : index
    %97 = memref.load %arg1[%c7_23] : memref<9xf32, #tpu.memory_space<smem>>
    %c30 = arith.constant 30 : index
    %98 = memref.load %arg2[%c30] : memref<36xf32, #tpu.memory_space<smem>>
    %99 = arith.mulf %97, %98 : f32
    %100 = arith.addf %96, %99 : f32
    %c8_24 = arith.constant 8 : index
    %101 = memref.load %arg1[%c8_24] : memref<9xf32, #tpu.memory_space<smem>>
    %c34 = arith.constant 34 : index
    %102 = memref.load %arg2[%c34] : memref<36xf32, #tpu.memory_space<smem>>
    %103 = arith.mulf %101, %102 : f32
    %104 = arith.addf %100, %103 : f32
    %c0_25 = arith.constant 0 : index
    %105 = memref.load %arg1[%c0_25] : memref<9xf32, #tpu.memory_space<smem>>
    %c3_26 = arith.constant 3 : index
    %106 = memref.load %arg2[%c3_26] : memref<36xf32, #tpu.memory_space<smem>>
    %107 = arith.mulf %105, %106 : f32
    %c1_27 = arith.constant 1 : index
    %108 = memref.load %arg1[%c1_27] : memref<9xf32, #tpu.memory_space<smem>>
    %c7_28 = arith.constant 7 : index
    %109 = memref.load %arg2[%c7_28] : memref<36xf32, #tpu.memory_space<smem>>
    %110 = arith.mulf %108, %109 : f32
    %111 = arith.addf %107, %110 : f32
    %c2_29 = arith.constant 2 : index
    %112 = memref.load %arg1[%c2_29] : memref<9xf32, #tpu.memory_space<smem>>
    %c11 = arith.constant 11 : index
    %113 = memref.load %arg2[%c11] : memref<36xf32, #tpu.memory_space<smem>>
    %114 = arith.mulf %112, %113 : f32
    %115 = arith.addf %111, %114 : f32
    %c3_30 = arith.constant 3 : index
    %116 = memref.load %arg1[%c3_30] : memref<9xf32, #tpu.memory_space<smem>>
    %c15 = arith.constant 15 : index
    %117 = memref.load %arg2[%c15] : memref<36xf32, #tpu.memory_space<smem>>
    %118 = arith.mulf %116, %117 : f32
    %119 = arith.addf %115, %118 : f32
    %c4_31 = arith.constant 4 : index
    %120 = memref.load %arg1[%c4_31] : memref<9xf32, #tpu.memory_space<smem>>
    %c19 = arith.constant 19 : index
    %121 = memref.load %arg2[%c19] : memref<36xf32, #tpu.memory_space<smem>>
    %122 = arith.mulf %120, %121 : f32
    %123 = arith.addf %119, %122 : f32
    %c5_32 = arith.constant 5 : index
    %124 = memref.load %arg1[%c5_32] : memref<9xf32, #tpu.memory_space<smem>>
    %c23 = arith.constant 23 : index
    %125 = memref.load %arg2[%c23] : memref<36xf32, #tpu.memory_space<smem>>
    %126 = arith.mulf %124, %125 : f32
    %127 = arith.addf %123, %126 : f32
    %c6_33 = arith.constant 6 : index
    %128 = memref.load %arg1[%c6_33] : memref<9xf32, #tpu.memory_space<smem>>
    %c27 = arith.constant 27 : index
    %129 = memref.load %arg2[%c27] : memref<36xf32, #tpu.memory_space<smem>>
    %130 = arith.mulf %128, %129 : f32
    %131 = arith.addf %127, %130 : f32
    %c7_34 = arith.constant 7 : index
    %132 = memref.load %arg1[%c7_34] : memref<9xf32, #tpu.memory_space<smem>>
    %c31 = arith.constant 31 : index
    %133 = memref.load %arg2[%c31] : memref<36xf32, #tpu.memory_space<smem>>
    %134 = arith.mulf %132, %133 : f32
    %135 = arith.addf %131, %134 : f32
    %c8_35 = arith.constant 8 : index
    %136 = memref.load %arg1[%c8_35] : memref<9xf32, #tpu.memory_space<smem>>
    %c35 = arith.constant 35 : index
    %137 = memref.load %arg2[%c35] : memref<36xf32, #tpu.memory_space<smem>>
    %138 = arith.mulf %136, %137 : f32
    %139 = arith.addf %135, %138 : f32
    %c0_36 = arith.constant 0 : index
    %c0_37 = arith.constant 0 : index
    %140 = vector.load %arg3[%c0_36, %c0_37] : memref<2x64xf32, #tpu.memory_space<vmem>>, vector<2x64xf32>
    %c0_38 = arith.constant 0 : index
    %c0_39 = arith.constant 0 : index
    %141 = vector.load %arg4[%c0_38, %c0_39] : memref<64x128xf32, #tpu.memory_space<vmem>>, vector<64x128xf32>
    %cst = arith.constant dense<0.000000e+00> : vector<2x128xf32>
    %142 = tpu.matmul %140, %141, %cst {dimension_numbers = #tpu.dot_dimension_numbers<[1], [0], [0], [1], [0, 0, 1, 1], [], []>} : vector<2x64xf32>, vector<64x128xf32>, vector<2x128xf32> -> vector<2x128xf32>
    %cst_40 = arith.constant 0.000000e+00 : f32
    %143 = vector.broadcast %cst_40 : f32 to vector<2x128xf32>
    %144 = arith.maximumf %142, %143 : vector<2x128xf32>
    %c0_41 = arith.constant 0 : index
    %c0_42 = arith.constant 0 : index
    %145 = vector.load %arg5[%c0_41, %c0_42] : memref<128x128xf32, #tpu.memory_space<vmem>>, vector<128x128xf32>
    %cst_43 = arith.constant dense<0.000000e+00> : vector<2x128xf32>
    %146 = tpu.matmul %144, %145, %cst_43 {dimension_numbers = #tpu.dot_dimension_numbers<[1], [0], [0], [1], [0, 0, 1, 1], [], []>} : vector<2x128xf32>, vector<128x128xf32>, vector<2x128xf32> -> vector<2x128xf32>
    %cst_44 = arith.constant 0.000000e+00 : f32
    %147 = vector.broadcast %cst_44 : f32 to vector<2x128xf32>
    %148 = arith.maximumf %146, %147 : vector<2x128xf32>
    %c0_45 = arith.constant 0 : index
    %c0_46 = arith.constant 0 : index
    %149 = vector.load %arg6[%c0_45, %c0_46] : memref<128x64xf32, #tpu.memory_space<vmem>>, vector<128x64xf32>
    %cst_47 = arith.constant dense<0.000000e+00> : vector<2x64xf32>
    %150 = tpu.matmul %148, %149, %cst_47 {dimension_numbers = #tpu.dot_dimension_numbers<[1], [0], [0], [1], [0, 0, 1, 1], [], []>} : vector<2x128xf32>, vector<128x64xf32>, vector<2x64xf32> -> vector<2x64xf32>
    %cst_48 = arith.constant -2.000000e+00 : f32
    %151 = vector.broadcast %cst_48 : f32 to vector<2x64xf32>
    %152 = arith.mulf %151, %150 : vector<2x64xf32>
    %153 = arith.mulf %152, %150 : vector<2x64xf32>
    %154 = arith.mulf %153, %150 : vector<2x64xf32>
    %cst_49 = arith.constant 1.500000e+00 : f32
    %155 = vector.broadcast %cst_49 : f32 to vector<2x64xf32>
    %156 = arith.mulf %155, %150 : vector<2x64xf32>
    %157 = arith.addf %154, %156 : vector<2x64xf32>
    %cst_50 = arith.constant 5.000000e-01 : f32
    %158 = vector.broadcast %cst_50 : f32 to vector<2x64xf32>
    %159 = arith.addf %157, %158 : vector<2x64xf32>
    %cst_51 = arith.constant -5.000000e-01 : f32
    %160 = vector.broadcast %cst_51 : f32 to vector<2x64xf32>
    %161 = arith.cmpf ole, %150, %160 : vector<2x64xf32>
    %cst_52 = arith.constant 0.000000e+00 : f32
    %162 = vector.broadcast %cst_52 : f32 to vector<2x64xf32>
    %cst_53 = arith.constant 5.000000e-01 : f32
    %163 = vector.broadcast %cst_53 : f32 to vector<2x64xf32>
    %164 = arith.cmpf oge, %150, %163 : vector<2x64xf32>
    %cst_54 = arith.constant 1.000000e+00 : f32
    %165 = vector.broadcast %cst_54 : f32 to vector<2x64xf32>
    %166 = arith.select %164, %165, %159 : vector<2x64xi1>, vector<2x64xf32>
    %167 = arith.select %161, %162, %166 : vector<2x64xi1>, vector<2x64xf32>
    %168 = vector.extract_strided_slice %167 {offsets = [0, 0], sizes = [2, 16], strides = [1, 1]} : vector<2x64xf32> to vector<2x16xf32>
    %169 = vector.broadcast %34 : f32 to vector<2x16xf32>
    %170 = arith.mulf %169, %168 : vector<2x16xf32>
    %171 = vector.extract_strided_slice %167 {offsets = [0, 16], sizes = [2, 16], strides = [1, 1]} : vector<2x64xf32> to vector<2x16xf32>
    %172 = vector.broadcast %69 : f32 to vector<2x16xf32>
    %173 = arith.mulf %172, %171 : vector<2x16xf32>
    %174 = arith.addf %170, %173 : vector<2x16xf32>
    %175 = vector.extract_strided_slice %167 {offsets = [0, 32], sizes = [2, 16], strides = [1, 1]} : vector<2x64xf32> to vector<2x16xf32>
    %176 = vector.broadcast %104 : f32 to vector<2x16xf32>
    %177 = arith.mulf %176, %175 : vector<2x16xf32>
    %178 = arith.addf %174, %177 : vector<2x16xf32>
    %179 = vector.extract_strided_slice %167 {offsets = [0, 48], sizes = [2, 16], strides = [1, 1]} : vector<2x64xf32> to vector<2x16xf32>
    %180 = vector.broadcast %139 : f32 to vector<2x16xf32>
    %181 = arith.mulf %180, %179 : vector<2x16xf32>
    %182 = arith.addf %178, %181 : vector<2x16xf32>
    %c0_55 = arith.constant 0 : index
    %c0_56 = arith.constant 0 : index
    %183 = vector.load %arg7[%c0_55, %c0_56] : memref<2x16xf32, #tpu.memory_space<vmem>>, vector<2x16xf32>
    tpu.vector_store %arg7[%c0_55, %c0_56], %182 {strides = array<i32>} : memref<2x16xf32, #tpu.memory_space<vmem>>, vector<2x16xf32>,
    return
  }
  func.func @transform_0(%arg0: i32) -> i32 {
    %c0_i32 = arith.constant 0 : i32
    %c0_i32_0 = arith.constant 0 : i32
    return %c0_i32 : i32
  }
  func.func @transform_1(%arg0: i32) -> i32 {
    %c0_i32 = arith.constant 0 : i32
    %c0_i32_0 = arith.constant 0 : i32
    return %c0_i32 : i32
  }
  func.func @transform_2(%arg0: i32) -> (i32, i32) {
    %c0_i32 = arith.constant 0 : i32
    %c0_i32_0 = arith.constant 0 : i32
    %c0_i32_1 = arith.constant 0 : i32
    return %c0_i32, %c0_i32_0 : i32, i32
  }
  func.func @transform_3(%arg0: i32) -> (i32, i32) {
    %c0_i32 = arith.constant 0 : i32
    %c0_i32_0 = arith.constant 0 : i32
    %c0_i32_1 = arith.constant 0 : i32
    return %c0_i32, %c0_i32_0 : i32, i32
  }
  func.func @transform_4(%arg0: i32) -> (i32, i32) {
    %c0_i32 = arith.constant 0 : i32
    %c0_i32_0 = arith.constant 0 : i32
    %c0_i32_1 = arith.constant 0 : i32
    return %c0_i32, %c0_i32_0 : i32, i32
  }
  func.func @transform_5(%arg0: i32) -> (i32, i32) {
    %c0_i32 = arith.constant 0 : i32
    %c0_i32_0 = arith.constant 0 : i32
    %c0_i32_1 = arith.constant 0 : i32
    return %c0_i32, %c0_i32_0 : i32, i32
  }
  func.func @transform_6(%arg0: i32) -> (i32, i32) {
    %c0_i32 = arith.constant 0 : i32
    %c0_i32_0 = arith.constant 0 : i32
    %c0_i32_1 = arith.constant 0 : i32
    return %c0_i32, %c0_i32_0 : i32, i32
  }
}

</mosaic_0001>

<bundles_post_ra>
// kernel: _mlp_forward.1
= control target key start
LH: loop header
LB: loop body
LE: loop exit
PB: predicated region body
PF: predicated region fallthrough
CT: control target
= control target key end

     0   :  { %s1056_s0 = inlined_call_operand.vmem [shape: f32[9], index: 0, kind: input, shape index: {}]   ;;  %s1057_s1 = inlined_call_operand.vmem [shape: f32[36], index: 1, kind: input, shape index: {}]   ;;  %s1058_s2 = inlined_call_operand.vmem [shape: f32[2,64], index: 2, kind: input, shape index: {}]   ;;  %s1059_s3 = inlined_call_operand.vmem [shape: f32[64,128], index: 3, kind: input, shape index: {}]   ;;  %s1060_s4 = inlined_call_operand.vmem [shape: f32[128,128], index: 4, kind: input, shape index: {}]   ;;  %s1061_s5 = inlined_call_operand.vmem [shape: f32[128,64], index: 5, kind: input, shape index: {}]   ;;  %s1062_s6 = inlined_call_operand.hbm [shape: f32[2,16], index: 6, kind: output, shape index: {}]  }
   0x1   :  { %1070 = sst [smem:[#allocation17_spill]] %s1062_s6 }
   0x2   :  { %11 = vsyncpa [#allocation4], 0 }
   0x3   :  { %12 = vsyncpa [#allocation6], 0 }
   0x4   :  { %13 = vsyncpa [#allocation3], 0  ;;  %s20_s23 = sshll.u32 %s1056_s0, 4  ;;  %s30_s26 = sshll.u32 %s1057_s1, 4  ;;  %s21_s23 = int_to_ptr.vmem [resolvable:$true] %s20_s23  ;;  %s31_s26 = int_to_ptr.vmem [resolvable:$true] %s30_s26 }
   0x5   :  { %s715_s27 = scalar_lea.vmem %s21_s23, 16  ;;  %p720_p1 = scmp.lt.s32.totalorder %s21_s23, %s21_s23 }
   0x6   :  { %p716_p0 = scmp.ne.s32.totalorder %s21_s23, %s715_s27  ;;  %p721_p2 = scmp.lt.s32.totalorder %s715_s27, %s715_s27 }
   0x8   :  { %p722_p3 = por %p721_p2, %p720_p1 }
   0xa   :  { %p723_p4 = pnand %p722_p3, %p716_p0 }
   0xc   :  { %726 = shalt.err (!%p723_p4)
}
   0xd   :  { %s767_s28 = smov [#allocation2]   ;;  %s727_s29 = scalar_lea.vmem %s31_s26, 16 }
   0xe   :  { %23 = dma.vmem_to_smem %s21_s23, 16, %s767_s28, [#allocation4]  }
   0xf   :  { %p728_p5 = scmp.ne.s32.totalorder %s31_s26, %s727_s29  ;;  %p732_p6 = scmp.lt.s32.totalorder %s31_s26, %s31_s26 }
  0x10   :  { %p733_p7 = scmp.lt.s32.totalorder %s727_s29, %s727_s29 }
  0x12   :  { %p734_p8 = por %p733_p7, %p732_p6 }
  0x14   :  { %p735_p9 = pnand %p734_p8, %p728_p5 }
  0x16   :  { %738 = shalt.err (!%p735_p9)
}
  0x17   :  { %s768_s0 = smov [#allocation5]  }
  0x18   :  { %33 = dma.vmem_to_smem %s31_s26, 16, %s768_s0, [#allocation6]  }
  0x19   :  { %761 = dma.done.wait [#allocation4], 16  }
  0x1a   :  { %762 = vsyncadd [#allocation4], 4294967280 }
  0x1b   :  { %763 = dma.done.wait [#allocation6], 16  }
  0x1c   :  { %764 = vsyncadd [#allocation6], 4294967280 }
  0x1d   :  { %48 = sfence }
  0x1e   :  { %v163_v0 = vld [vmem:[%s1059_s3] sm:$0xff]  ;;  %v164_v1 = vld [vmem:[%s1059_s3 + $0x8] sm:$0xff]  ;;  %v165_v2 = vld [vmem:[%s1059_s3 + $0x10] sm:$0xff]  ;;  %v769_v3 = vmov 0.0|0.0   ;;  %vm770_vm0 = vmmov 0   ;;  %v771_v6 = vmov 0.0  }
  0x1f   :  { %646 = vmatprep.subr.bf16.mxu0 %v769_v3  ;;  %v647_v4 = vpack.c.bf16 %v164_v1, %v163_v0  ;;  %v166_v5 = vld [vmem:[%s1059_s3 + $0x18] sm:$0xff]  ;;  %573 = vmatprep.mubr.msk.f32.mxu0 %vm770_vm0, %v771_v6  ;;  %v246_v8 = vld [vmem:[%s1060_s4] sm:$0xff]  ;;  %v247_v9 = vld [vmem:[%s1060_s4 + $0x8] sm:$0xff]  ;;  %vm171_vm1 = vcmask 523264   ;;  %s963_s0 = sld [smem:[#allocation2 + $0x1]]  ;;  %s471_s1 = sld [smem:[#allocation5 + $0x4]] }
  0x20   :  { %658 = vmatprep.subr.bf16.mxu1 %v769_v3  ;;  %608 = vmatprep.mubr.msk.f32.mxu1 %vm770_vm0, %v771_v6  ;;  %v650_v7 = vpack.c.bf16 %v166_v5, %v165_v2  ;;  %v248_v10 = vld [vmem:[%s1060_s4 + $0x10] sm:$0xff]  ;;  %v167_v11 = vld [vmem:[%s1059_s3 + $0x20] sm:$0xff]  ;;  %v168_v12 = vld [vmem:[%s1059_s3 + $0x28] sm:$0xff]  ;;  %v659_v13 = vpack.c.bf16 %v247_v9, %v246_v8  ;;  %s965_s30 = sld [smem:[#allocation2 + $0x2]]  ;;  %s473_s7 = sld [smem:[#allocation5 + $0x8]]  ;;  %vm452_vm4 = vcmask 123904  }
  0x21   :  { %648 = vmatpush3.bf16.msra.mxu0 %v647_v4  ;;  %v249_v14 = vld [vmem:[%s1060_s4 + $0x18] sm:$0xff]  ;;  %v653_v16 = vpack.c.bf16 %v168_v12, %v167_v11  ;;  %v250_v17 = vld [vmem:[%s1060_s4 + $0x20] sm:$0xff]  ;;  %v251_v18 = vld [vmem:[%s1060_s4 + $0x28] sm:$0xff]  ;;  %s967_s8 = sld [smem:[#allocation2]]  ;;  %s969_s9 = sld [smem:[#allocation2 + $0x3]] }
  0x22   :  { %649 = vmatprep.subr.bf16.mxu0 %v769_v3  ;;  %660 = vmatpush3.bf16.msra.mxu1 %v659_v13  ;;  %v662_v15 = vpack.c.bf16 %v249_v14, %v248_v10  ;;  %v169_v19 = vld [vmem:[%s1059_s3 + $0x30] sm:$0xff]  ;;  %v170_v20 = vld [vmem:[%s1059_s3 + $0x38] sm:$0xff]  ;;  %v665_v21 = vpack.c.bf16 %v251_v18, %v250_v17  ;;  %v162_v26 = vld [vmem:[%s1058_s2] sm:$0x3]  ;;  %s971_s10 = sld [smem:[#allocation2 + $0x4]]  ;;  %s477_s3 = sld [smem:[#allocation5 + $0x10]] }
  0x23   :  { %661 = vmatprep.subr.bf16.mxu1 %v769_v3  ;;  %v656_v22 = vpack.c.bf16 %v170_v20, %v169_v19  ;;  %v252_v23 = vld [vmem:[%s1060_s4 + $0x30] sm:$0xff]  ;;  %v253_v24 = vld [vmem:[%s1060_s4 + $0x38] sm:$0xff]  ;;  %v254_v27 = vld [vmem:[%s1060_s4 + $0x40] sm:$0xff]  ;;  %s973_s11 = sld [smem:[#allocation2 + $0x5]]  ;;  %s479_s13 = sld [smem:[#allocation5 + $0x14]] }
  0x24   :  { %v668_v25 = vpack.c.bf16 %v253_v24, %v252_v23  ;;  %v255_v28 = vld [vmem:[%s1060_s4 + $0x48] sm:$0xff]  ;;  %v256_v30 = vld [vmem:[%s1060_s4 + $0x50] sm:$0xff]  ;;  %v257_v31 = vld [vmem:[%s1060_s4 + $0x58] sm:$0xff]  ;;  %s976_s14 = sld [smem:[#allocation2 + $0x6]]  ;;  %s481_s16 = sld [smem:[#allocation5 + $0x18]] }
  0x25   :  { %651 = vmatpush3.bf16.msra.mxu0 %v650_v7  ;;  %v671_v29 = vpack.c.bf16 %v255_v28, %v254_v27  ;;  %v674_v32 = vpack.c.bf16 %v257_v31, %v256_v30  ;;  %v258_v33 = vld [vmem:[%s1060_s4 + $0x60] sm:$0xff]  ;;  %v259_v34 = vld [vmem:[%s1060_s4 + $0x68] sm:$0xff]  ;;  %v260_v36 = vld [vmem:[%s1060_s4 + $0x70] sm:$0xff]  ;;  %s54_s12 = smul.f32 %s471_s1, %s963_s0  ;;  %s980_s17 = sld [smem:[#allocation2 + $0x7]] }
  0x26   :  { %652 = vmatprep.subr.bf16.mxu0 %v769_v3  ;;  %663 = vmatpush3.bf16.msra.mxu1 %v662_v15  ;;  %v677_v35 = vpack.c.bf16 %v259_v34, %v258_v33  ;;  %v261_v37 = vld [vmem:[%s1060_s4 + $0x78] sm:$0xff]  ;;  %v333_v39 = vld [vmem:[%s1061_s5] sm:$0xff]  ;;  %v334_v40 = vld [vmem:[%s1061_s5 + $0x8] sm:$0xff]  ;;  %s50_s4 = sld [smem:[#allocation5]]  ;;  %s58_s15 = smul.f32 %s473_s7, %s965_s30 }
  0x27   :  { %664 = vmatprep.subr.bf16.mxu1 %v769_v3  ;;  %v680_v38 = vpack.c.bf16 %v261_v37, %v260_v36  ;;  %v335_v41 = vld [vmem:[%s1061_s5 + $0x10] sm:$0xff]  ;;  %v683_v42 = vpack.c.bf16 %v334_v40, %v333_v39  ;;  %v336_v43 = vld [vmem:[%s1061_s5 + $0x18] sm:$0xff]  ;;  %v337_v45 = vld [vmem:[%s1061_s5 + $0x20] sm:$0xff]  ;;  %s483_s18 = sld [smem:[#allocation5 + $0x1c]]  ;;  %s983_s21 = sld [smem:[#allocation2 + $0x8]] }
  0x28   :  { %v686_v44 = vpack.c.bf16 %v336_v43, %v335_v41  ;;  %v338_v46 = vld [vmem:[%s1061_s5 + $0x28] sm:$0xff]  ;;  %v339_v48 = vld [vmem:[%s1061_s5 + $0x30] sm:$0xff]  ;;  %v340_v49 = vld [vmem:[%s1061_s5 + $0x38] sm:$0xff]  ;;  %s485_s22 = sld [smem:[#allocation5 + $0x20]]  ;;  %s66_s23 = smul.f32 %s477_s3, %s971_s10 }
  0x29   :  { %654 = vmatpush3.bf16.msra.mxu0 %v653_v16  ;;  %v689_v47 = vpack.c.bf16 %v338_v46, %v337_v45  ;;  %v692_v50 = vpack.c.bf16 %v340_v49, %v339_v48  ;;  %v341_v51 = vld [vmem:[%s1061_s5 + $0x40] sm:$0xff]  ;;  %v342_v52 = vld [vmem:[%s1061_s5 + $0x48] sm:$0xff]  ;;  %v343_v54 = vld [vmem:[%s1061_s5 + $0x50] sm:$0xff]  ;;  %s70_s25 = smul.f32 %s479_s13, %s973_s11  ;;  %s486_s3 = sld [smem:[#allocation5 + $0x1]] }
  0x2a   :  { %655 = vmatprep.subr.bf16.mxu0 %v769_v3  ;;  %666 = vmatpush3.bf16.msra.mxu1 %v665_v21  ;;  %v695_v53 = vpack.c.bf16 %v342_v52, %v341_v51  ;;  %v344_v55 = vld [vmem:[%s1061_s5 + $0x58] sm:$0xff]  ;;  %v345_v57 = vld [vmem:[%s1061_s5 + $0x60] sm:$0xff]  ;;  %v346_v58 = vld [vmem:[%s1061_s5 + $0x68] sm:$0xff]  ;;  %1071 = sst [smem:[#allocation11_spill]] %s976_s14  ;;  %s74_s27 = smul.f32 %s481_s16, %s976_s14 }
  0x2b   :  { %667 = vmatprep.subr.bf16.mxu1 %v769_v3  ;;  %v698_v56 = vpack.c.bf16 %v344_v55, %v343_v54  ;;  %v701_v59 = vpack.c.bf16 %v346_v58, %v345_v57  ;;  %v347_v63 = vld [vmem:[%s1061_s5 + $0x70] sm:$0xff]  ;;  %v348_v0 = vld [vmem:[%s1061_s5 + $0x78] sm:$0xff]  ;;  %s475_s5 = sld [smem:[#allocation5 + $0xc]]  ;;  %1072 = sst [smem:[#allocation12_spill]] %s980_s17 }
  0x2c   :  { %v704_v1 = vpack.c.bf16 %v348_v0, %v347_v63  ;;  %s51_s2 = smul.f32 %s50_s4, %s967_s8  ;;  %s506_s13 = sld [smem:[#allocation5 + $0xb]] }
  0x2d   :  { %657 = vmatpush3.bf16.msra.mxu0 %v656_v22  ;;  %1073 = sst [smem:[#allocation13_spill]] %s983_s21  ;;  %s78_s29 = smul.f32 %s483_s18, %s980_s17 }
  0x2e   :  { %682 = vmatprep.subr.bf16.mxu0 %v769_v3  ;;  %669 = vmatpush3.bf16.msra.mxu1 %v668_v25  ;;  %s55_s20 = sadd.f32 %s54_s12, %s51_s2  ;;  %s82_s7 = smul.f32 %s485_s22, %s983_s21 }
  0x2f   :  { %670 = vmatprep.subr.bf16.mxu1 %v769_v3  ;;  %s504_s12 = sld [smem:[#allocation5 + $0x3]]  ;;  %s505_s2 = sld [smem:[#allocation5 + $0x7]] }
  0x30   :  { %574 = vmatmul.mubr.msk.f32.vlgmr.msra.gmra.mrb[0].mxu0 %vm171_vm1, %v162_v26  ;;  %s59_s24 = sadd.f32 %s58_s15, %s55_s20  ;;  %s487_s15 = sld [smem:[#allocation5 + $0x5]] }
  0x31   :  { %643 = vmatprep.mubr.msk.f32.mxu0 %vm770_vm0, %v771_v6  ;;  %684 = vmatpush3.bf16.msra.mxu0 %v683_v42  ;;  %s62_s19 = smul.f32 %s475_s5, %s969_s9  ;;  %s488_s18 = sld [smem:[#allocation5 + $0x9]] }
  0x32   :  { %672 = vmatpush3.bf16.msra.mxu1 %v671_v29  ;;  %685 = vmatprep.subr.bf16.mxu0 %v769_v3  ;;  %s495_s22 = sld [smem:[#allocation5 + $0x2]]  ;;  %s498_s17 = sld [smem:[#allocation5 + $0xe]] }
  0x33   :  { %673 = vmatprep.subr.bf16.mxu1 %v769_v3  ;;  %s63_s26 = sadd.f32 %s62_s19, %s59_s24  ;;  %s992_s19 = sld [smem:[#allocation5 + $0xf]] }
  0x34   :  { %s998_s24 = sld [smem:[#allocation5 + $0x13]] }
  0x35   :  { %687 = vmatpush3.bf16.msra.mxu0 %v686_v44  ;;  %s67_s28 = sadd.f32 %s66_s23, %s63_s26  ;;  %s137_s16 = smul.f32 %s504_s12, %s967_s8 }
  0x36   :  { %675 = vmatpush3.bf16.msra.mxu1 %v674_v32  ;;  %688 = vmatprep.subr.bf16.mxu0 %v769_v3  ;;  %s139_s20 = smul.f32 %s505_s2, %s963_s0  ;;  %s996_s23 = sld [smem:[#allocation5 + $0xd]] }
  0x37   :  { %676 = vmatprep.subr.bf16.mxu1 %v769_v3  ;;  %s71_s1 = sadd.f32 %s70_s25, %s67_s28  ;;  %s85_s25 = smul.f32 %s486_s3, %s967_s8 }
  0x38   :  { %s87_s26 = smul.f32 %s487_s15, %s963_s0  ;;  %s140_s28 = sadd.f32 %s139_s20, %s137_s16 }
  0x39   :  { %690 = vmatpush3.bf16.msra.mxu0 %v689_v47  ;;  %s75_s4 = sadd.f32 %s74_s27, %s71_s1  ;;  %s1002_s27 = sld [smem:[#allocation5 + $0x11]] }
  0x3a   :  { %678 = vmatpush3.bf16.msra.mxu1 %v677_v35  ;;  %691 = vmatprep.subr.bf16.mxu0 %v769_v3  ;;  %s1005_s1 = sld [smem:[#allocation5 + $0x17]]  ;;  %s1009_s12 = sld [smem:[#allocation5 + $0x1b]] }
  0x3b   :  { %679 = vmatprep.subr.bf16.mxu1 %v769_v3  ;;  %s79_s6 = sadd.f32 %s78_s29, %s75_s4  ;;  %s142_s29 = smul.f32 %s506_s13, %s965_s30 }
  0x3c   :  { %s145_s4 = smul.f32 %s992_s19, %s969_s9  ;;  %s88_s2 = sadd.f32 %s87_s26, %s85_s25 }
  0x3d   :  { %693 = vmatpush3.bf16.msra.mxu0 %v692_v50  ;;  %s990_s5 = sadd.f32 %s82_s7, %s79_s6  ;;  %s496_s6 = sld [smem:[#allocation5 + $0x6]] }
  0x3e   :  { %681 = vmatpush3.bf16.msra.mxu1 %v680_v38  ;;  %694 = vmatprep.subr.bf16.mxu0 %v769_v3  ;;  %s497_s7 = sld [smem:[#allocation5 + $0xa]]  ;;  %s143_s21 = sadd.f32 %s142_s29, %s140_s28 }
  0x3f   :  { %1074 = sst [smem:[#allocation14_spill]] %s990_s5  ;;  %s90_s5 = smul.f32 %s488_s18, %s965_s30 }
  0x40   :  { %1075 = sst [smem:[#allocation15_spill]] %s1009_s12  ;;  %s111_s3 = smul.f32 %s495_s22, %s967_s8 }
  0x41   :  { %696 = vmatpush3.bf16.msra.mxu0 %v695_v53  ;;  %s148_s16 = smul.f32 %s998_s24, %s971_s10  ;;  %s491_s13 = sld [smem:[#allocation5 + $0x15]] }
  0x42   :  { %697 = vmatprep.subr.bf16.mxu0 %v769_v3  ;;  %s91_s20 = sadd.f32 %s90_s5, %s88_s2  ;;  %s93_s14 = smul.f32 %s996_s23, %s969_s9 }
  0x43   :  { %s113_s15 = smul.f32 %s496_s6, %s963_s0  ;;  %s1018_s19 = sld [smem:[#allocation5 + $0x1f]] }
  0x44   :  { %s499_s12 = sld [smem:[#allocation5 + $0x12]]  ;;  %s116_s26 = smul.f32 %s497_s7, %s965_s30 }
  0x45   :  { %699 = vmatpush3.bf16.msra.mxu0 %v698_v56  ;;  %s114_s25 = sadd.f32 %s113_s15, %s111_s3  ;;  %s492_s28 = sld [smem:[#allocation5 + $0x19]] }
  0x46   :  { %700 = vmatprep.subr.bf16.mxu0 %v769_v3  ;;  %s146_s18 = sadd.f32 %s145_s4, %s143_s21  ;;  %s1077_s29 = sld [smem:[#allocation11_spill]] }
  0x47   :  { %s1078_s8 = sld [smem:[#allocation15_spill]]  ;;  %s94_s22 = sadd.f32 %s93_s14, %s91_s20 }
  0x48   :  { %s96_s0 = smul.f32 %s1002_s27, %s971_s10  ;;  %s500_s24 = sld [smem:[#allocation5 + $0x16]] }
  0x49   :  { %702 = vmatpush3.bf16.msra.mxu0 %v701_v59  ;;  %1076 = sst [smem:[#allocation16_spill]] %s1018_s19  ;;  %s151_s6 = smul.f32 %s1005_s1, %s973_s11 }
  0x4a   :  { %703 = vmatprep.subr.bf16.mxu0 %v769_v3  ;;  %s117_s2 = sadd.f32 %s116_s26, %s114_s25  ;;  %s119_s5 = smul.f32 %s498_s17, %s969_s9 }
  0x4b   :  { %s149_s23 = sadd.f32 %s148_s16, %s146_s18  ;;  %s1026_s19 = sld [smem:[#allocation5 + $0x23]] }
  0x4c   :  { %s1079_s3 = sld [smem:[#allocation12_spill]]  ;;  %s1080_s15 = sld [smem:[#allocation16_spill]] }
  0x4d   :  { %705 = vmatpush3.bf16.msra.mxu0 %v704_v1  ;;  %s97_s7 = sadd.f32 %s96_s0, %s94_s22  ;;  %s99_s30 = smul.f32 %s491_s13, %s973_s11 }
  0x4e   :  { %s493_s21 = sld [smem:[#allocation5 + $0x1d]]  ;;  %s501_s4 = sld [smem:[#allocation5 + $0x1a]] }
  0x4f   :  { %s120_s14 = sadd.f32 %s119_s5, %s117_s2  ;;  %s122_s20 = smul.f32 %s499_s12, %s971_s10 }
  0x50   :  { %s152_s27 = sadd.f32 %s151_s6, %s149_s23  ;;  %s154_s1 = smul.f32 %s1078_s8, %s1077_s29 }
  0x51   :  { %s1081_s25 = sld [smem:[#allocation13_spill]]  ;;  %s100_s26 = sadd.f32 %s99_s30, %s97_s7 }
  0x52   :  { %s102_s9 = smul.f32 %s492_s28, %s1077_s29  ;;  %s494_s17 = sld [smem:[#allocation5 + $0x21]] }
  0x53   :  { %s502_s16 = sld [smem:[#allocation5 + $0x1e]]  ;;  %s123_s18 = sadd.f32 %s122_s20, %s120_s14 }
  0x54   :  { %s125_s0 = smul.f32 %s500_s24, %s973_s11  ;;  %s155_s22 = sadd.f32 %s154_s1, %s152_s27 }
  0x55   :  { %s157_s13 = smul.f32 %s1080_s15, %s1079_s3  ;;  %s103_s2 = sadd.f32 %s102_s9, %s100_s26 }
  0x56   :  { %s105_s5 = smul.f32 %s493_s21, %s1079_s3  ;;  %s503_s10 = sld [smem:[#allocation5 + $0x22]] }
  0x57   :  { %s126_s12 = sadd.f32 %s125_s0, %s123_s18  ;;  %s128_s6 = smul.f32 %s501_s4, %s1077_s29 }
  0x58   :  { %s158_s8 = sadd.f32 %s157_s13, %s155_s22  ;;  %s160_s23 = smul.f32 %s1026_s19, %s1081_s25 }
  0x59   :  { %s106_s28 = sadd.f32 %s105_s5, %s103_s2  ;;  %s108_s7 = smul.f32 %s494_s17, %s1081_s25 }
  0x5a   :  { %s1082_s30 = sld [smem:[#allocation14_spill]]  ;;  %s129_s14 = sadd.f32 %s128_s6, %s126_s12 }
  0x5b   :  { %s131_s20 = smul.f32 %s502_s16, %s1079_s3  ;;  %s161_s11 = sadd.f32 %s160_s23, %s158_s8 }
  0x5c   :  { %s109_s24 = sadd.f32 %s108_s7, %s106_s28  ;;  %s134_s21 = smul.f32 %s503_s10, %s1081_s25 }
  0x5d   :  { %s132_s15 = sadd.f32 %s131_s20, %s129_s14  ;;  %v445_v13 = vstv %s161_s11  ;;  %s772_s29 = smov 80  }
  0x5e   :  { %v431_v14 = vstv %s109_s24  ;;  %s773_s3 = smov 112   ;;  %s774_s4 = smov 96  }
  0x5f   :  { %s135_s19 = sadd.f32 %s134_s21, %s132_s15  ;;  %s775_s27 = smov [#allocation7]  }
  0x60   :  { %v429_v15 = vstv %s1082_s30  ;;  %s460_s1 = sshll.u32 %s775_s27, 4  ;;  %s461_s1 = int_to_ptr.vmem [resolvable:$true] %s460_s1 }
  0x61   :  { %v438_v21 = vstv %s135_s19  ;;  %s739_s25 = scalar_lea.vmem %s461_s1, 32  ;;  %p744_p11 = scmp.lt.s32.totalorder %s461_s1, %s461_s1 }
  0x62   :  { %p740_p10 = scmp.ne.s32.totalorder %s461_s1, %s739_s25  ;;  %p745_p12 = scmp.lt.s32.totalorder %s739_s25, %s739_s25 }
  0x64   :  { %p746_p13 = por %p745_p12, %p744_p11 }
  0x66   :  { %p747_p0 = pnand %p746_p13, %p740_p10 }
 0x103   :  { %v241_v60 = vpop.f32.mrb[0].mxu0 }
 0x104   :  { %v245_v61 = vmax.f32 %v241_v60, 0.0  ;;  %v575_v62 = vpop.f32.mrb[1].mxu0 }
 0x106   :  { %609 = vmatmul.mubr.f32.vlgmr.msra.gmra.mrb[0].mxu1 %v245_v61 }
 0x1d9   :  { %v328_v2 = vpop.f32.mrb[0].mxu1 }
 0x1da   :  { %v332_v4 = vmax.f32 %v328_v2, 0.0  ;;  %v610_v5 = vpop.f32.mrb[1].mxu1 }
 0x1dc   :  { %644 = vmatmul.mubr.f32.vlgmr.msra.gmra.mrb[2].mxu0 %v332_v4 }
 0x2af   :  { %v415_v3 = vpop.f32.mrb[2].mxu0 }
 0x2b0   :  { %v419_v6 = vmul.f32 -2.0, %v415_v3  ;;  %v645_v7 = vpop.f32.mrb[3].mxu0  ;;  %v422_v10 = vmul.f32 1.5, %v415_v3  ;;  %vm426_vm2 = vcmp.ge.f32.partialorder %v415_v3, 0.5  ;;  %vm425_vm3 = vcmp.le.f32.partialorder %v415_v3, -0.5 }
 0x2b2   :  { %v420_v8 = vmul.f32 %v419_v6, %v415_v3 }
 0x2b4   :  { %v421_v9 = vmul.f32 %v420_v8, %v415_v3 }
 0x2b6   :  { %v423_v11 = vadd.f32 %v422_v10, %v421_v9 }
 0x2b8   :  { %v424_v12 = vadd.f32 0.5, %v423_v11 }
 0x2ba   :  { %v427_v16 = vsel %vm426_vm2, 1.0, %v424_v12 }
 0x2bb   :  { %v428_v17 = vsel %vm425_vm3, 0.0, %v427_v16 }
 0x2bc   :  { %v446_v18 = vmul.f32 %v445_v13, %v428_v17  ;;  %v432_v19 = vmul.f32 %v431_v14, %v428_v17  ;;  %v430_v20 = vmul.f32 %v429_v15, %v428_v17  ;;  %v439_v22 = vmul.f32 %v438_v21, %v428_v17 }
 0x2be   :  { %448 = vrot.lane.b32.xlu1 %v446_v18, %s772_s29  ;;  %434 = vrot.lane.b32.xlu0 %v432_v19, %s773_s3 }
 0x2c2   :  { %441 = vrot.lane.b32.xlu0 %v439_v22, %s774_s4 }
 0x330   :  { %v435_v23 = vpop.permute.xlu0 %434  ;;  %v449_v27 = vpop.permute.xlu1 %448 }
 0x331   :  { %v437_v24 = vadd.f32 %v435_v23, %v430_v20 }
 0x334   :  { %v442_v25 = vpop.permute.xlu0 %441 }
 0x335   :  { %v444_v26 = vadd.f32 %v442_v25, %v437_v24 }
 0x337   :  { %v451_v28 = vadd.f32 %v449_v27, %v444_v26 }
 0x339   :  { %453 = vst.msk [vmem:[#allocation7] sm:$0x3] %vm452_vm4, %v451_v28 }
 0x33a   :  { %750 = shalt.err (!%p747_p0)
}
 0x33b   :  { %s1083_s17 = sld [smem:[#allocation17_spill]] }
 0x341   :  { %s751_s16 = scalar_lea.hbm %s1083_s17, 32 }
 0x342   :  { %p752_p1 = scmp.ne.s32.totalorder %s1083_s17, %s751_s16  ;;  %p755_p2 = scmp.lt.u32.totalorder %s751_s16, %s1083_s17 }
 0x344   :  { %p757_p3 = pnand %p755_p2, %p752_p1 }
 0x346   :  { %760 = shalt.err (!%p757_p3)
}
 0x347   :  { %463 = dma.vmem_to_hbm [thread:$0]  %s461_s1, 32, %s1083_s17, [#allocation3]  }
 0x348   :  { %765 = dma.done.wait [#allocation3], 32  }
 0x349   :  { %766 = vsyncadd [#allocation3], 4294967264 }
 0x34a   :  { %467 = vsyncpa [#allocation3], 1 }
 0x34b   :  { %468 = vsyncpa [#allocation4], 1 }
 0x34c   :  { %469 = vsyncpa [#allocation6], 1 }

</bundles_post_ra>
